<compile_context>
chip_gen: v5e
topology: v5e:2x2
jax: 0.10.0
libtpu: 0.0.40
codegen_flags: <defaults>
</compile_context>

<pallas_src>
import functools

import jax
import jax.numpy as jnp
from jax import lax
from jax.experimental import pallas as pl
from jax.experimental.pallas import tpu as pltpu


def _round_up(x, m):
    return ((x + m - 1) // m) * m


def rnn_kernel(ids_ref, p_ref, out_ref, *, T, B, BP, Vp, H,
               r_wh, r_bih, r_w1, r_b1, r_w2, r_b2):
    """Fused myRNN forward; everything VMEM/SMEM resident (KiB scale).

    ids_ref : (B, T)  int32 in SMEM   token ids
    p_ref   : (R, 2H) f32   in VMEM   packed params:
                rows [0, Vp)      cols [0, H) : embW = embedding @ W_e
                rows [r_wh, +H)   cols [0, H) : W_h
                row  r_bih        cols [0, H) : b_ih
                rows [r_w1, +H)   cols [0,2H) : W1^T
                row  r_b1         cols [0,2H) : b1
                row  r_w2         cols [0,2H) : w2 (row vector)
                row  r_b2         col  0      : b2
    out_ref : (B, 1)  f32
    """
    TBP = T * BP

    # ---- Time-major, batch-padded id column built in-kernel from SMEM
    #      scalars (kills the wrapper-side transpose/reshape dispatch).
    #      Padding rows get id -1 -> all-zero one-hot row; their garbage
    #      hidden state is never read at the output. ----
    row_iota = lax.broadcasted_iota(jnp.int32, (TBP, 1), 0)
    ids_col = jnp.full((TBP, 1), -1, jnp.int32)
    for t in range(T):
        for b in range(B):
            ids_col = jnp.where(row_iota == (t * BP + b), ids_ref[b, t],
                                ids_col)

    # ---- Fused embedding lookup + input projection: one-hot @ (emb @ W_e),
    #      bias added once for all timesteps. ----
    # TODO(synk): once V grows past a few hundred, replace the one-hot matmul
    # with an id-indexed row gather (dynamic first-axis reads / DMA gather)
    # and move embW behind memory_space=pl.ANY (v7x scoped VMEM is half of
    # v5e/v6e, so the VMEM-residency cliff arrives at half the table size).
    iota_v = lax.broadcasted_iota(jnp.int32, (TBP, Vp), 1)
    one_hot = jnp.where(iota_v == ids_col, 1.0, 0.0).astype(jnp.float32)
    embw = p_ref[pl.ds(0, Vp), 0:H]                              # (Vp, H)
    b_ih = p_ref[pl.ds(r_bih, 1), 0:H]                           # (1, H)
    a_in = jnp.dot(one_hot, embw,
                   preferred_element_type=jnp.float32) + b_ih    # (TBP, H)

    # ---- Recurrence: h_t = tanh(a_in[t] + h_{t-1} @ W_h), fully unrolled.
    #      Step 0 skips the matmul (h_{-1} == 0); all slices 8-row aligned. ----
    # TODO(synk): stage W_h in the MXU across the T steps via
    # pltpu.matmul_push_rhs/acc_lhs/pop once a bundle dump confirms repeated
    # per-step RHS pushes (mind v7x MRB in-place-accumulate semantics).
    w_h = p_ref[pl.ds(r_wh, H), 0:H]                             # (H, H)
    h = jnp.tanh(a_in[0:BP, :])
    for t in range(1, T):
        a_t = a_in[t * BP:(t + 1) * BP, :]                       # (BP, H)
        h = jnp.tanh(a_t + jnp.dot(h, w_h,
                                   preferred_element_type=jnp.float32))

    # ---- MLP head: ReLU(h @ W1 + b1), then 1-wide projection on VPU/XLU
    #      (multiply + lane reduce instead of a 1-lane MXU pass). ----
    w1 = p_ref[pl.ds(r_w1, H), :]                                # (H, 2H)
    b1 = p_ref[pl.ds(r_b1, 1), :]                                # (1, 2H)
    w2 = p_ref[pl.ds(r_w2, 1), :]                                # (1, 2H)
    b2 = p_ref[pl.ds(r_b2, 1), 0:1]                              # (1, 1)
    z = jnp.maximum(
        jnp.dot(h, w1, preferred_element_type=jnp.float32) + b1, 0.0)
    out_full = jnp.sum(z * w2, axis=-1, keepdims=True) + b2      # (BP, 1)
    out_ref[...] = out_full[0:B, :]


def prepare_params(embed_table, w_ih, b_ih, w1, b1, w2, b2):
    """One-time packing of ALL parameters into a single f32 array.

    w_ih: (H, E+H) PyTorch nn.Linear layout (out, in); w1: (2H, H); w2: (1,2H).
    The input projection is folded into the embedding table (embW = emb @ W_e)
    so the kernel prologue is a single matmul. Every block's row offset is a
    multiple of 8 sublanes; H-wide blocks live in columns [0, H).
    """
    V, E = embed_table.shape
    H = w_ih.shape[0]
    w_e = jnp.transpose(w_ih[:, :E]).astype(jnp.float32)         # (E, H)
    w_h = jnp.transpose(w_ih[:, E:]).astype(jnp.float32)         # (H, H)
    embw = jnp.dot(embed_table.astype(jnp.float32), w_e,
                   precision=jax.lax.Precision.HIGHEST)          # (V, H)

    Vp = _round_up(V, 8)
    Hp = _round_up(H, 8)
    r_wh = Vp
    r_bih = r_wh + Hp
    r_w1 = r_bih + 8
    r_b1 = r_w1 + Hp
    r_w2 = r_b1 + 8
    r_b2 = r_w2 + 8
    rows = r_b2 + 8

    p = jnp.zeros((rows, 2 * H), jnp.float32)
    p = p.at[0:V, 0:H].set(embw)
    p = p.at[r_wh:r_wh + H, 0:H].set(w_h)
    p = p.at[r_bih, 0:H].set(b_ih.astype(jnp.float32))
    p = p.at[r_w1:r_w1 + H, :].set(jnp.transpose(w1).astype(jnp.float32))
    p = p.at[r_b1, :].set(b1.astype(jnp.float32))
    p = p.at[r_w2, :].set(w2.reshape(-1).astype(jnp.float32))
    p = p.at[r_b2, 0].set(b2.astype(jnp.float32)[0])
    return p


@jax.jit
def my_rnn_forward(token_ids, params):
    """token_ids: (B, T) int32; params: packed array from prepare_params()."""
    B, T = token_ids.shape
    R, two_h = params.shape
    H = two_h // 2
    Hp = _round_up(H, 8)
    # Recover the (static) packed layout from the array shape.
    r_b2 = R - 8
    r_w2 = r_b2 - 8
    r_b1 = r_w2 - 8
    r_w1 = r_b1 - Hp
    r_bih = r_w1 - 8
    r_wh = r_bih - Hp
    Vp = r_wh
    BP = max(8, _round_up(B, 8))       # pad batch to the f32 sublane count

    kernel = functools.partial(
        rnn_kernel, T=T, B=B, BP=BP, Vp=Vp, H=H,
        r_wh=r_wh, r_bih=r_bih, r_w1=r_w1, r_b1=r_b1, r_w2=r_w2, r_b2=r_b2)

    # TODO(synk): when BP exceeds one MXU tile (128 rows on v5e, 256 on
    # v6e/v7x), add a batch grid with dimension_semantics=("parallel",) so
    # v7x's second TensorCore shares the work; pure overhead at this size.
    out = pl.pallas_call(
        kernel,
        out_shape=jax.ShapeDtypeStruct((B, 1), jnp.float32),
        in_specs=[pl.BlockSpec(memory_space=pltpu.MemorySpace.SMEM),
                  pl.BlockSpec(memory_space=pltpu.MemorySpace.VMEM)],
        out_specs=pl.BlockSpec(memory_space=pltpu.MemorySpace.VMEM),
    )(token_ids, params)
    return out[:, 0]  # == output.squeeze() for B > 1


def reference_forward(token_ids, embed_table, w_ih, b_ih, w1, b1, w2, b2):
    """Pure-JAX reference mirroring the PyTorch forward exactly."""
    B, T = token_ids.shape
    H = w_ih.shape[0]
    e = jnp.take(embed_table, token_ids, axis=0)  # (B, T, E)
    h = jnp.zeros((B, H), jnp.float32)
    for t in range(T):
        tmp = jnp.concatenate([e[:, t, :], h], axis=1)
        h = jnp.tanh(tmp @ w_ih.T + b_ih)
    z = jnp.maximum(h @ w1.T + b1, 0.0)   # dropout is identity at inference
    out = z @ w2.T + b2
    return out.squeeze()


if __name__ == "__main__":
    # cfg: vocab_size=16, embedding_dim=32, hidden_size=32, max_len=8, batch=2
    V, E, H, T, B = 16, 32, 32, 8, 2

    key = jax.random.PRNGKey(0)
    keys = jax.random.split(key, 8)

    embed_table = jax.random.normal(keys[0], (V, E), jnp.float32) * 0.1
    w_ih = jax.random.normal(keys[1], (H, E + H), jnp.float32) * 0.1
    b_ih = jax.random.normal(keys[2], (H,), jnp.float32) * 0.1
    w1 = jax.random.normal(keys[3], (2 * H, H), jnp.float32) * 0.1
    b1 = jax.random.normal(keys[4], (2 * H,), jnp.float32) * 0.1
    w2 = jax.random.normal(keys[5], (1, 2 * H), jnp.float32) * 0.1
    b2 = jax.random.normal(keys[6], (1,), jnp.float32) * 0.1

    token_ids = jax.random.randint(keys[7], (B, T), 0, V, dtype=jnp.int32)

    # One-time parameter packing (outside the jitted per-call forward).
    params = prepare_params(embed_table, w_ih, b_ih, w1, b1, w2, b2)

    out = my_rnn_forward(token_ids, params)
    out = jax.block_until_ready(out)

    ref = reference_forward(token_ids, embed_table, w_ih, b_ih, w1, b1, w2, b2)
    assert out.shape == (B,), out.shape
    assert jnp.allclose(out, ref, atol=1e-4, rtol=1e-4), (out, ref)

    print("KERNEL_OK")
</pallas_src>

<mosaic_0001>
module attributes {stable_mosaic.version = 11 : i64} {
  func.func @rnn_kernel(%arg0: memref<2x8xi32, #tpu.memory_space<smem>>, %arg1: memref<112x64xf32, #tpu.memory_space<vmem>>, %arg2: memref<2x1xf32, #tpu.memory_space<vmem>>) attributes {dimension_semantics = [], scalar_prefetch = 0 : i64, scratch_operands = 0 : i64, tpu.core_type = #tpu.core_type<tc>} {
    %0 = tpu.iota {dimensions = array<i32: 0>} : vector<64x1xi32>
    %c-1_i32 = arith.constant -1 : i32
    %1 = vector.broadcast %c-1_i32 : i32 to vector<64x1xi32>
    %c0_i32 = arith.constant 0 : i32
    %2 = vector.broadcast %c0_i32 : i32 to vector<64x1xi32>
    %3 = arith.cmpi eq, %0, %2 : vector<64x1xi32>
    %c0 = arith.constant 0 : index
    %c0_0 = arith.constant 0 : index
    %4 = memref.load %arg0[%c0, %c0_0] : memref<2x8xi32, #tpu.memory_space<smem>>
    %5 = vector.broadcast %4 : i32 to vector<64x1xi32>
    %6 = arith.select %3, %5, %1 : vector<64x1xi1>, vector<64x1xi32>
    %c1_i32 = arith.constant 1 : i32
    %7 = vector.broadcast %c1_i32 : i32 to vector<64x1xi32>
    %8 = arith.cmpi eq, %0, %7 : vector<64x1xi32>
    %c1 = arith.constant 1 : index
    %c0_1 = arith.constant 0 : index
    %9 = memref.load %arg0[%c1, %c0_1] : memref<2x8xi32, #tpu.memory_space<smem>>
    %10 = vector.broadcast %9 : i32 to vector<64x1xi32>
    %11 = arith.select %8, %10, %6 : vector<64x1xi1>, vector<64x1xi32>
    %c8_i32 = arith.constant 8 : i32
    %12 = vector.broadcast %c8_i32 : i32 to vector<64x1xi32>
    %13 = arith.cmpi eq, %0, %12 : vector<64x1xi32>
    %c0_2 = arith.constant 0 : index
    %c1_3 = arith.constant 1 : index
    %14 = memref.load %arg0[%c0_2, %c1_3] : memref<2x8xi32, #tpu.memory_space<smem>>
    %15 = vector.broadcast %14 : i32 to vector<64x1xi32>
    %16 = arith.select %13, %15, %11 : vector<64x1xi1>, vector<64x1xi32>
    %c9_i32 = arith.constant 9 : i32
    %17 = vector.broadcast %c9_i32 : i32 to vector<64x1xi32>
    %18 = arith.cmpi eq, %0, %17 : vector<64x1xi32>
    %c1_4 = arith.constant 1 : index
    %c1_5 = arith.constant 1 : index
    %19 = memref.load %arg0[%c1_4, %c1_5] : memref<2x8xi32, #tpu.memory_space<smem>>
    %20 = vector.broadcast %19 : i32 to vector<64x1xi32>
    %21 = arith.select %18, %20, %16 : vector<64x1xi1>, vector<64x1xi32>
    %c16_i32 = arith.constant 16 : i32
    %22 = vector.broadcast %c16_i32 : i32 to vector<64x1xi32>
    %23 = arith.cmpi eq, %0, %22 : vector<64x1xi32>
    %c0_6 = arith.constant 0 : index
    %c2 = arith.constant 2 : index
    %24 = memref.load %arg0[%c0_6, %c2] : memref<2x8xi32, #tpu.memory_space<smem>>
    %25 = vector.broadcast %24 : i32 to vector<64x1xi32>
    %26 = arith.select %23, %25, %21 : vector<64x1xi1>, vector<64x1xi32>
    %c17_i32 = arith.constant 17 : i32
    %27 = vector.broadcast %c17_i32 : i32 to vector<64x1xi32>
    %28 = arith.cmpi eq, %0, %27 : vector<64x1xi32>
    %c1_7 = arith.constant 1 : index
    %c2_8 = arith.constant 2 : index
    %29 = memref.load %arg0[%c1_7, %c2_8] : memref<2x8xi32, #tpu.memory_space<smem>>
    %30 = vector.broadcast %29 : i32 to vector<64x1xi32>
    %31 = arith.select %28, %30, %26 : vector<64x1xi1>, vector<64x1xi32>
    %c24_i32 = arith.constant 24 : i32
    %32 = vector.broadcast %c24_i32 : i32 to vector<64x1xi32>
    %33 = arith.cmpi eq, %0, %32 : vector<64x1xi32>
    %c0_9 = arith.constant 0 : index
    %c3 = arith.constant 3 : index
    %34 = memref.load %arg0[%c0_9, %c3] : memref<2x8xi32, #tpu.memory_space<smem>>
    %35 = vector.broadcast %34 : i32 to vector<64x1xi32>
    %36 = arith.select %33, %35, %31 : vector<64x1xi1>, vector<64x1xi32>
    %c25_i32 = arith.constant 25 : i32
    %37 = vector.broadcast %c25_i32 : i32 to vector<64x1xi32>
    %38 = arith.cmpi eq, %0, %37 : vector<64x1xi32>
    %c1_10 = arith.constant 1 : index
    %c3_11 = arith.constant 3 : index
    %39 = memref.load %arg0[%c1_10, %c3_11] : memref<2x8xi32, #tpu.memory_space<smem>>
    %40 = vector.broadcast %39 : i32 to vector<64x1xi32>
    %41 = arith.select %38, %40, %36 : vector<64x1xi1>, vector<64x1xi32>
    %c32_i32 = arith.constant 32 : i32
    %42 = vector.broadcast %c32_i32 : i32 to vector<64x1xi32>
    %43 = arith.cmpi eq, %0, %42 : vector<64x1xi32>
    %c0_12 = arith.constant 0 : index
    %c4 = arith.constant 4 : index
    %44 = memref.load %arg0[%c0_12, %c4] : memref<2x8xi32, #tpu.memory_space<smem>>
    %45 = vector.broadcast %44 : i32 to vector<64x1xi32>
    %46 = arith.select %43, %45, %41 : vector<64x1xi1>, vector<64x1xi32>
    %c33_i32 = arith.constant 33 : i32
    %47 = vector.broadcast %c33_i32 : i32 to vector<64x1xi32>
    %48 = arith.cmpi eq, %0, %47 : vector<64x1xi32>
    %c1_13 = arith.constant 1 : index
    %c4_14 = arith.constant 4 : index
    %49 = memref.load %arg0[%c1_13, %c4_14] : memref<2x8xi32, #tpu.memory_space<smem>>
    %50 = vector.broadcast %49 : i32 to vector<64x1xi32>
    %51 = arith.select %48, %50, %46 : vector<64x1xi1>, vector<64x1xi32>
    %c40_i32 = arith.constant 40 : i32
    %52 = vector.broadcast %c40_i32 : i32 to vector<64x1xi32>
    %53 = arith.cmpi eq, %0, %52 : vector<64x1xi32>
    %c0_15 = arith.constant 0 : index
    %c5 = arith.constant 5 : index
    %54 = memref.load %arg0[%c0_15, %c5] : memref<2x8xi32, #tpu.memory_space<smem>>
    %55 = vector.broadcast %54 : i32 to vector<64x1xi32>
    %56 = arith.select %53, %55, %51 : vector<64x1xi1>, vector<64x1xi32>
    %c41_i32 = arith.constant 41 : i32
    %57 = vector.broadcast %c41_i32 : i32 to vector<64x1xi32>
    %58 = arith.cmpi eq, %0, %57 : vector<64x1xi32>
    %c1_16 = arith.constant 1 : index
    %c5_17 = arith.constant 5 : index
    %59 = memref.load %arg0[%c1_16, %c5_17] : memref<2x8xi32, #tpu.memory_space<smem>>
    %60 = vector.broadcast %59 : i32 to vector<64x1xi32>
    %61 = arith.select %58, %60, %56 : vector<64x1xi1>, vector<64x1xi32>
    %c48_i32 = arith.constant 48 : i32
    %62 = vector.broadcast %c48_i32 : i32 to vector<64x1xi32>
    %63 = arith.cmpi eq, %0, %62 : vector<64x1xi32>
    %c0_18 = arith.constant 0 : index
    %c6 = arith.constant 6 : index
    %64 = memref.load %arg0[%c0_18, %c6] : memref<2x8xi32, #tpu.memory_space<smem>>
    %65 = vector.broadcast %64 : i32 to vector<64x1xi32>
    %66 = arith.select %63, %65, %61 : vector<64x1xi1>, vector<64x1xi32>
    %c49_i32 = arith.constant 49 : i32
    %67 = vector.broadcast %c49_i32 : i32 to vector<64x1xi32>
    %68 = arith.cmpi eq, %0, %67 : vector<64x1xi32>
    %c1_19 = arith.constant 1 : index
    %c6_20 = arith.constant 6 : index
    %69 = memref.load %arg0[%c1_19, %c6_20] : memref<2x8xi32, #tpu.memory_space<smem>>
    %70 = vector.broadcast %69 : i32 to vector<64x1xi32>
    %71 = arith.select %68, %70, %66 : vector<64x1xi1>, vector<64x1xi32>
    %c56_i32 = arith.constant 56 : i32
    %72 = vector.broadcast %c56_i32 : i32 to vector<64x1xi32>
    %73 = arith.cmpi eq, %0, %72 : vector<64x1xi32>
    %c0_21 = arith.constant 0 : index
    %c7 = arith.constant 7 : index
    %74 = memref.load %arg0[%c0_21, %c7] : memref<2x8xi32, #tpu.memory_space<smem>>
    %75 = vector.broadcast %74 : i32 to vector<64x1xi32>
    %76 = arith.select %73, %75, %71 : vector<64x1xi1>, vector<64x1xi32>
    %c57_i32 = arith.constant 57 : i32
    %77 = vector.broadcast %c57_i32 : i32 to vector<64x1xi32>
    %78 = arith.cmpi eq, %0, %77 : vector<64x1xi32>
    %c1_22 = arith.constant 1 : index
    %c7_23 = arith.constant 7 : index
    %79 = memref.load %arg0[%c1_22, %c7_23] : memref<2x8xi32, #tpu.memory_space<smem>>
    %80 = vector.broadcast %79 : i32 to vector<64x1xi32>
    %81 = arith.select %78, %80, %76 : vector<64x1xi1>, vector<64x1xi32>
    %82 = tpu.iota {dimensions = array<i32: 1>} : vector<64x16xi32>
    %83 = vector.broadcast %81 : vector<64x1xi32> to vector<64x16xi32>
    %84 = arith.cmpi eq, %82, %83 : vector<64x16xi32>
    %cst = arith.constant 1.000000e+00 : f32
    %cst_24 = arith.constant 0.000000e+00 : f32
    %85 = vector.broadcast %cst : f32 to vector<64x16xf32>
    %86 = vector.broadcast %cst_24 : f32 to vector<64x16xf32>
    %87 = arith.select %84, %85, %86 : vector<64x16xi1>, vector<64x16xf32>
    %c0_25 = arith.constant 0 : index
    %c0_26 = arith.constant 0 : index
    %88 = vector.load %arg1[%c0_25, %c0_26] : memref<112x64xf32, #tpu.memory_space<vmem>>, vector<16x32xf32>
    %c48 = arith.constant 48 : index
    %c0_27 = arith.constant 0 : index
    %89 = vector.load %arg1[%c48, %c0_27] : memref<112x64xf32, #tpu.memory_space<vmem>>, vector<1x32xf32>
    %cst_28 = arith.constant dense<0.000000e+00> : vector<64x32xf32>
    %90 = tpu.matmul %87, %88, %cst_28 {dimension_numbers = #tpu.dot_dimension_numbers<[1], [0], [0], [1], [0, 0, 1, 1], [], []>} : vector<64x16xf32>, vector<16x32xf32>, vector<64x32xf32> -> vector<64x32xf32>
    %91 = vector.broadcast %89 : vector<1x32xf32> to vector<64x32xf32>
    %92 = arith.addf %90, %91 : vector<64x32xf32>
    %c16 = arith.constant 16 : index
    %c0_29 = arith.constant 0 : index
    %93 = vector.load %arg1[%c16, %c0_29] : memref<112x64xf32, #tpu.memory_space<vmem>>, vector<32x32xf32>
    %94 = vector.extract_strided_slice %92 {offsets = [0, 0], sizes = [8, 32], strides = [1, 1]} : vector<64x32xf32> to vector<8x32xf32>
    %95 = math.tanh %94 : vector<8x32xf32>
    %96 = vector.extract_strided_slice %92 {offsets = [8, 0], sizes = [8, 32], strides = [1, 1]} : vector<64x32xf32> to vector<8x32xf32>
    %cst_30 = arith.constant dense<0.000000e+00> : vector<8x32xf32>
    %97 = tpu.matmul %95, %93, %cst_30 {dimension_numbers = #tpu.dot_dimension_numbers<[1], [0], [0], [1], [0, 0, 1, 1], [], []>} : vector<8x32xf32>, vector<32x32xf32>, vector<8x32xf32> -> vector<8x32xf32>
    %98 = arith.addf %96, %97 : vector<8x32xf32>
    %99 = math.tanh %98 : vector<8x32xf32>
    %100 = vector.extract_strided_slice %92 {offsets = [16, 0], sizes = [8, 32], strides = [1, 1]} : vector<64x32xf32> to vector<8x32xf32>
    %cst_31 = arith.constant dense<0.000000e+00> : vector<8x32xf32>
    %101 = tpu.matmul %99, %93, %cst_31 {dimension_numbers = #tpu.dot_dimension_numbers<[1], [0], [0], [1], [0, 0, 1, 1], [], []>} : vector<8x32xf32>, vector<32x32xf32>, vector<8x32xf32> -> vector<8x32xf32>
    %102 = arith.addf %100, %101 : vector<8x32xf32>
    %103 = math.tanh %102 : vector<8x32xf32>
    %104 = vector.extract_strided_slice %92 {offsets = [24, 0], sizes = [8, 32], strides = [1, 1]} : vector<64x32xf32> to vector<8x32xf32>
    %cst_32 = arith.constant dense<0.000000e+00> : vector<8x32xf32>
    %105 = tpu.matmul %103, %93, %cst_32 {dimension_numbers = #tpu.dot_dimension_numbers<[1], [0], [0], [1], [0, 0, 1, 1], [], []>} : vector<8x32xf32>, vector<32x32xf32>, vector<8x32xf32> -> vector<8x32xf32>
    %106 = arith.addf %104, %105 : vector<8x32xf32>
    %107 = math.tanh %106 : vector<8x32xf32>
    %108 = vector.extract_strided_slice %92 {offsets = [32, 0], sizes = [8, 32], strides = [1, 1]} : vector<64x32xf32> to vector<8x32xf32>
    %cst_33 = arith.constant dense<0.000000e+00> : vector<8x32xf32>
    %109 = tpu.matmul %107, %93, %cst_33 {dimension_numbers = #tpu.dot_dimension_numbers<[1], [0], [0], [1], [0, 0, 1, 1], [], []>} : vector<8x32xf32>, vector<32x32xf32>, vector<8x32xf32> -> vector<8x32xf32>
    %110 = arith.addf %108, %109 : vector<8x32xf32>
    %111 = math.tanh %110 : vector<8x32xf32>
    %112 = vector.extract_strided_slice %92 {offsets = [40, 0], sizes = [8, 32], strides = [1, 1]} : vector<64x32xf32> to vector<8x32xf32>
    %cst_34 = arith.constant dense<0.000000e+00> : vector<8x32xf32>
    %113 = tpu.matmul %111, %93, %cst_34 {dimension_numbers = #tpu.dot_dimension_numbers<[1], [0], [0], [1], [0, 0, 1, 1], [], []>} : vector<8x32xf32>, vector<32x32xf32>, vector<8x32xf32> -> vector<8x32xf32>
    %114 = arith.addf %112, %113 : vector<8x32xf32>
    %115 = math.tanh %114 : vector<8x32xf32>
    %116 = vector.extract_strided_slice %92 {offsets = [48, 0], sizes = [8, 32], strides = [1, 1]} : vector<64x32xf32> to vector<8x32xf32>
    %cst_35 = arith.constant dense<0.000000e+00> : vector<8x32xf32>
    %117 = tpu.matmul %115, %93, %cst_35 {dimension_numbers = #tpu.dot_dimension_numbers<[1], [0], [0], [1], [0, 0, 1, 1], [], []>} : vector<8x32xf32>, vector<32x32xf32>, vector<8x32xf32> -> vector<8x32xf32>
    %118 = arith.addf %116, %117 : vector<8x32xf32>
    %119 = math.tanh %118 : vector<8x32xf32>
    %120 = vector.extract_strided_slice %92 {offsets = [56, 0], sizes = [8, 32], strides = [1, 1]} : vector<64x32xf32> to vector<8x32xf32>
    %cst_36 = arith.constant dense<0.000000e+00> : vector<8x32xf32>
    %121 = tpu.matmul %119, %93, %cst_36 {dimension_numbers = #tpu.dot_dimension_numbers<[1], [0], [0], [1], [0, 0, 1, 1], [], []>} : vector<8x32xf32>, vector<32x32xf32>, vector<8x32xf32> -> vector<8x32xf32>
    %122 = arith.addf %120, %121 : vector<8x32xf32>
    %123 = math.tanh %122 : vector<8x32xf32>
    %c56 = arith.constant 56 : index
    %c0_37 = arith.constant 0 : index
    %124 = vector.load %arg1[%c56, %c0_37] : memref<112x64xf32, #tpu.memory_space<vmem>>, vector<32x64xf32>
    %c88 = arith.constant 88 : index
    %c0_38 = arith.constant 0 : index
    %125 = vector.load %arg1[%c88, %c0_38] : memref<112x64xf32, #tpu.memory_space<vmem>>, vector<1x64xf32>
    %c96 = arith.constant 96 : index
    %c0_39 = arith.constant 0 : index
    %126 = vector.load %arg1[%c96, %c0_39] : memref<112x64xf32, #tpu.memory_space<vmem>>, vector<1x64xf32>
    %c104 = arith.constant 104 : index
    %c0_40 = arith.constant 0 : index
    %127 = vector.load %arg1[%c104, %c0_40] : memref<112x64xf32, #tpu.memory_space<vmem>>, vector<1x1xf32>
    %cst_41 = arith.constant dense<0.000000e+00> : vector<8x64xf32>
    %128 = tpu.matmul %123, %124, %cst_41 {dimension_numbers = #tpu.dot_dimension_numbers<[1], [0], [0], [1], [0, 0, 1, 1], [], []>} : vector<8x32xf32>, vector<32x64xf32>, vector<8x64xf32> -> vector<8x64xf32>
    %129 = vector.broadcast %125 : vector<1x64xf32> to vector<8x64xf32>
    %130 = arith.addf %128, %129 : vector<8x64xf32>
    %cst_42 = arith.constant 0.000000e+00 : f32
    %131 = vector.broadcast %cst_42 : f32 to vector<8x64xf32>
    %132 = arith.maximumf %130, %131 : vector<8x64xf32>
    %133 = vector.broadcast %126 : vector<1x64xf32> to vector<8x64xf32>
    %134 = arith.mulf %132, %133 : vector<8x64xf32>
    %cst_43 = arith.constant dense<0.000000e+00> : vector<8xf32>
    %135 = vector.multi_reduction <add>, %134, %cst_43 [1] : vector<8x64xf32> to vector<8xf32>
    %136 = vector.shape_cast %135 : vector<8xf32> to vector<8x1xf32>
    %137 = vector.broadcast %127 : vector<1x1xf32> to vector<8x1xf32>
    %138 = arith.addf %136, %137 : vector<8x1xf32>
    %139 = vector.extract_strided_slice %138 {offsets = [0, 0], sizes = [2, 1], strides = [1, 1]} : vector<8x1xf32> to vector<2x1xf32>
    %c0_44 = arith.constant 0 : index
    %c0_45 = arith.constant 0 : index
    %140 = vector.load %arg2[%c0_44, %c0_45] : memref<2x1xf32, #tpu.memory_space<vmem>>, vector<2x1xf32>
    tpu.vector_store %arg2[%c0_44, %c0_45], %139 {strides = array<i32>} : memref<2x1xf32, #tpu.memory_space<vmem>>, vector<2x1xf32>,
    return
  }
}

</mosaic_0001>

<bundles_post_ra>
// kernel: my_rnn_forward.1
= control target key start
LH: loop header
LB: loop body
LE: loop exit
PB: predicated region body
PF: predicated region fallthrough
CT: control target
= control target key end

     0   :  { %7 = vsyncpa [#allocation3], 0  ;;  %s706_s12 = smov [#allocation2]   ;;  %s862_s0 = inlined_call_operand.vmem [shape: s32[2,8], index: 0, kind: input, shape index: {}]   ;;  %s863_s1 = inlined_call_operand.vmem [shape: f32[112,64], index: 1, kind: input, shape index: {}]   ;;  %s864_s2 = inlined_call_operand.vmem [shape: f32[2,1], index: 2, kind: output, shape index: {}]  }
   0x1   :  { %s13_s11 = sshll.u32 %s862_s0, 4  ;;  %s14_s11 = int_to_ptr.vmem [resolvable:$true] %s13_s11 }
   0x2   :  { %16 = dma.vmem_to_smem %s14_s11, 32, %s706_s12, [#allocation3]  }
   0x3   :  { %704 = dma.done.wait [#allocation3], 32  }
   0x4   :  { %705 = vsyncadd [#allocation3], 4294967264 }
   0x5   :  { %23 = sfence }
   0x6   :  { %v340_v0 = vld [vmem:[%s863_s1 + $0x8] sm:$0xff]  ;;  %v339_v1 = vld [vmem:[%s863_s1] sm:$0xff]  ;;  %v24_v2 = vlaneseq  ;;  %s41_s17 = sld [smem:[#allocation2]]  ;;  %vm343_vm2 = vcmask 130048   ;;  %v707_v9 = vmov 0.0   ;;  %v757_v16 = vld [vmem:[%s863_s1 + $0x18] sm:$0xff] }
   0x7   :  { %382 = vmatpush.msra.mxu0 %v340_v0  ;;  %s637_s18 = sld [smem:[#allocation2 + $0x80]]  ;;  %668 = vmatpush.msra.mxu3 %v340_v0  ;;  %v745_v12 = vld [vmem:[%s863_s1 + $0x28] sm:$0xff]  ;;  %v751_v13 = vld [vmem:[%s863_s1 + $0x20] sm:$0xff]  ;;  %v766_v19 = vld [vmem:[%s863_s1 + $0x10] sm:$0xff]  ;;  %vm414_vm7 = vcmask 261120  }
   0x8   :  { %v732_v3 = vshrl.u32 %v24_v2, 7  ;;  %v736_v4 = vand.u32 127, %v24_v2  ;;  %s638_s0 = sld [smem:[#allocation2 + $0x1]]  ;;  %430 = vmatpush.msra.mxu1 %v745_v12  ;;  %455 = vmatpush.msra.mxu2 %v745_v12  ;;  %v788_v21 = vld [vmem:[%s863_s1 + $0x30] ss:$0 sm:$0xff] }
   0x9   :  { %383 = vmatpush.msra.mxu0 %v339_v1  ;;  %669 = vmatpush.msra.mxu3 %v339_v1  ;;  %s639_s19 = sld [smem:[#allocation2 + $0x81]] }
   0xa   :  { %vm33_vm0 = vcmp.eq.s32.totalorder %v732_v3, 0  ;;  %vm51_vm1 = vcmp.eq.s32.totalorder %v732_v3, 1  ;;  %v26_v11 = vadd.s32 8, %v732_v3  ;;  %431 = vmatpush.msra.mxu1 %v751_v13  ;;  %456 = vmatpush.msra.mxu2 %v751_v13  ;;  %s640_s30 = sld [smem:[#allocation2 + $0x2]]  ;;  %v27_v25 = vadd.s32 16, %v732_v3 }
   0xb   :  { %480 = vmatpush.msrb.mxu3 %v745_v12  ;;  %s641_s3 = sld [smem:[#allocation2 + $0x82]]  ;;  %v30_v29 = vadd.s32 40, %v732_v3  ;;  %v31_v33 = vadd.s32 48, %v732_v3  ;;  %v32_v48 = vadd.s32 56, %v732_v3  ;;  %v28_v54 = vadd.s32 24, %v732_v3 }
   0xc   :  { %v42_v5 = vstv %s41_s17  ;;  %vm70_vm4 = vcmp.eq.s32.totalorder %v26_v11, 8  ;;  %vm88_vm5 = vcmp.eq.s32.totalorder %v26_v11, 9  ;;  %432 = vmatpush.msra.mxu1 %v757_v16  ;;  %457 = vmatpush.msra.mxu2 %v757_v16  ;;  %s646_s4 = sld [smem:[#allocation2 + $0x5]]  ;;  %vm107_vm8 = vcmp.eq.s32.totalorder %v27_v25, 16 }
   0xd   :  { %v43_v6 = vsel %vm33_vm0, %v42_v5, 4294967295  ;;  %v60_v7 = vstv %s637_s18  ;;  %481 = vmatpush.msrb.mxu3 %v751_v13  ;;  %s647_s5 = sld [smem:[#allocation2 + $0x85]]  ;;  %vm125_vm9 = vcmp.eq.s32.totalorder %v27_v25, 17  ;;  %vm218_vm11 = vcmp.eq.s32.totalorder %v30_v29, 40 }
   0xe   :  { %v61_v8 = vsel %vm51_vm1, %v60_v7, %v43_v6  ;;  %v78_v14 = vstv %s638_s0  ;;  %433 = vmatpush.msra.mxu1 %v766_v19  ;;  %458 = vmatpush.msra.mxu2 %v766_v19  ;;  %s648_s6 = sld [smem:[#allocation2 + $0x6]]  ;;  %vm236_vm12 = vcmp.eq.s32.totalorder %v30_v29, 41  ;;  %vm255_vm13 = vcmp.eq.s32.totalorder %v31_v33, 48  ;;  %v593_v29 = vld [vmem:[%s863_s1 + $0x50] sm:$0xff] }
   0xf   :  { %vm323_vm3 = vcmp.eq.s32.totalorder %v736_v4, %v61_v8  ;;  %v96_v15 = vstv %s639_s19  ;;  %v80_v17 = vsel %vm70_vm4, %v78_v14, 4294967295  ;;  %482 = vmatpush.msrb.mxu3 %v757_v16  ;;  %s649_s7 = sld [smem:[#allocation2 + $0x86]]  ;;  %vm273_vm14 = vcmp.eq.s32.totalorder %v31_v33, 49 }
  0x10   :  { %v331_v10 = vsel %vm323_vm3, 1.0, %v707_v9  ;;  %v98_v18 = vsel %vm88_vm5, %v96_v15, %v80_v17  ;;  %505 = vmatpush.msrb.mxu1 %v745_v12  ;;  %530 = vmatpush.msrb.mxu2 %v745_v12  ;;  %v114_v26 = vstv %s640_s30  ;;  %s650_s8 = sld [smem:[#allocation2 + $0x7]]  ;;  %vm292_vm1 = vcmp.eq.s32.totalorder %v32_v48, 56 }
  0x11   :  { %652 = vmatmul.msk.f32.vlgmr.msra.gmra.mxu0 %vm343_vm2, %v331_v10  ;;  %vm324_vm6 = vcmp.eq.s32.totalorder %v736_v4, %v98_v18  ;;  %483 = vmatpush.msrb.mxu3 %v766_v19  ;;  %v117_v27 = vsel %vm107_vm8, %v114_v26, 4294967295  ;;  %v132_v28 = vstv %s641_s3  ;;  %s651_s9 = sld [smem:[#allocation2 + $0x87]]  ;;  %vm310_vm3 = vcmp.eq.s32.totalorder %v32_v48, 57 }
  0x12   :  { %v332_v20 = vsel %vm324_vm6, 1.0, %v707_v9  ;;  %506 = vmatpush.msrb.mxu1 %v751_v13  ;;  %531 = vmatpush.msrb.mxu2 %v751_v13  ;;  %v135_v30 = vsel %vm125_vm9, %v132_v28, %v117_v27  ;;  %v222_v31 = vstv %s646_s4  ;;  %s642_s10 = sld [smem:[#allocation2 + $0x3]]  ;;  %vm144_vm5 = vcmp.eq.s32.totalorder %v28_v54, 24 }
  0x13   :  { %v240_v32 = vstv %s647_s5  ;;  %vm325_vm10 = vcmp.eq.s32.totalorder %v736_v4, %v135_v30  ;;  %v228_v36 = vsel %vm218_vm11, %v222_v31, 4294967295  ;;  %s643_s11 = sld [smem:[#allocation2 + $0x83]]  ;;  %vm162_vm6 = vcmp.eq.s32.totalorder %v28_v54, 25  ;;  %v592_v30 = vld [vmem:[%s863_s1 + $0x48] sm:$0xff]  ;;  %v591_v31 = vld [vmem:[%s863_s1 + $0x40] sm:$0xff] }
  0x14   :  { %507 = vmatpush.msrb.mxu1 %v757_v16  ;;  %532 = vmatpush.msrb.mxu2 %v757_v16  ;;  %v258_v34 = vstv %s648_s6  ;;  %v333_v35 = vsel %vm325_vm10, 1.0, %v707_v9  ;;  %v246_v37 = vsel %vm236_vm12, %v240_v32, %v228_v36  ;;  %s644_s12 = sld [smem:[#allocation2 + $0x4]]  ;;  %v29_v1 = vadd.s32 32, %v732_v3  ;;  %v590_v32 = vld [vmem:[%s863_s1 + $0x38] sm:$0xff] }
  0x15   :  { %v265_v38 = vsel %vm255_vm13, %v258_v34, 4294967295  ;;  %v276_v39 = vstv %s649_s7  ;;  %vm328_vm15 = vcmp.eq.s32.totalorder %v736_v4, %v246_v37  ;;  %s645_s13 = sld [smem:[#allocation2 + $0x84]]  ;;  %v673_v37 = vld [vmem:[%s863_s1 + $0x58] ss:$0 sm:$0xff] }
  0x16   :  { %508 = vmatpush.msrb.mxu1 %v766_v19  ;;  %533 = vmatpush.msrb.mxu2 %v766_v19  ;;  %v336_v40 = vsel %vm328_vm15, 1.0, %v707_v9  ;;  %v283_v41 = vsel %vm273_vm14, %v276_v39, %v265_v38  ;;  %v294_v49 = vstv %s650_s8  ;;  %vm181_vm9 = vcmp.eq.s32.totalorder %v29_v1, 32 }
  0x17   :  { %657 = vmatmul.msk.f32.vlgmr.msra.gmra.mxu3 %vm343_vm2, %v336_v40  ;;  %vm329_vm0 = vcmp.eq.s32.totalorder %v736_v4, %v283_v41  ;;  %v302_v50 = vsel %vm292_vm1, %v294_v49, 4294967295  ;;  %v312_v51 = vstv %s651_s9  ;;  %vm199_vm10 = vcmp.eq.s32.totalorder %v29_v1, 33  ;;  %v674_v40 = vld [vmem:[%s863_s1 + $0x60] ss:$0 sm:$0xff] }
  0x18   :  { %555 = vmatpush.msra.mxu3 %v745_v12  ;;  %v337_v42 = vsel %vm329_vm0, 1.0, %v707_v9  ;;  %v320_v52 = vsel %vm310_vm3, %v312_v51, %v302_v50  ;;  %v150_v55 = vstv %s642_s10 }
  0x19   :  { %653 = vmatmul.msk.f32.gmra.mxu0 %vm343_vm2, %v332_v20  ;;  %vm330_vm4 = vcmp.eq.s32.totalorder %v736_v4, %v320_v52  ;;  %v154_v56 = vsel %vm144_vm5, %v150_v55, 4294967295  ;;  %v168_v57 = vstv %s643_s11 }
  0x1a   :  { %556 = vmatpush.msra.mxu3 %v751_v13  ;;  %v338_v53 = vsel %vm330_vm4, 1.0, %v707_v9  ;;  %v172_v58 = vsel %vm162_vm6, %v168_v57, %v154_v56  ;;  %v186_v5 = vstv %s644_s12 }
  0x1b   :  { %vm326_vm8 = vcmp.eq.s32.totalorder %v736_v4, %v172_v58  ;;  %v204_v6 = vstv %s645_s13  ;;  %v191_v7 = vsel %vm181_vm9, %v186_v5, 4294967295 }
  0x1c   :  { %557 = vmatpush.msra.mxu3 %v757_v16  ;;  %v334_v59 = vsel %vm326_vm8, 1.0, %v707_v9  ;;  %v209_v8 = vsel %vm199_vm10, %v204_v6, %v191_v7 }
  0x1d   :  { %vm327_vm11 = vcmp.eq.s32.totalorder %v736_v4, %v209_v8 }
  0x1e   :  { %558 = vmatpush.msra.mxu3 %v766_v19  ;;  %v335_v10 = vsel %vm327_vm11, 1.0, %v707_v9 }
  0x1f   :  { %658 = vmatmul.msk.f32.gmra.mxu3 %vm343_vm2, %v337_v42 }
  0x21   :  { %654 = vmatmul.msk.f32.gmra.mxu0 %vm343_vm2, %v333_v35 }
  0x27   :  { %659 = vmatmul.msk.f32.gmra.mxu3 %vm343_vm2, %v338_v53 }
  0x29   :  { %655 = vmatmul.msk.f32.gmra.mxu0 %vm343_vm2, %v334_v59 }
  0x31   :  { %656 = vmatmul.msk.f32.gmra.mxu0 %vm343_vm2, %v335_v10  ;;  %vm624_vm2 = vcmask 523264  }
  0x8e   :  { %v385_v22 = vpop.f32.mrf.mxu0 }
  0x8f   :  { %v386_v23 = vadd.f32 %v788_v21, %v385_v22 }
  0x91   :  { %676 = vtanh.f32 %v386_v23 }
  0x96   :  { %v388_v43 = vpop.f32.mrf.mxu0 }
  0x97   :  { %v677_v24 = vpop.eup %676  ;;  %v389_v44 = vadd.f32 %v788_v21, %v388_v43  ;;  %v675_v43 = vld [vmem:[%s863_s1 + $0x68] ss:$0 sm:$0xff] }
  0x98   :  { %660 = vmatmul.msk.f32.vlgmr.msra.gmra.mxu1 %vm414_vm7, %v677_v24 }
  0x99   :  { %580 = vmatpush.msra.mxu1 %v745_v12 }
  0x9a   :  { %v400_v2 = vpop.f32.mrf.mxu3 }
  0x9b   :  { %581 = vmatpush.msra.mxu1 %v751_v13  ;;  %v401_v20 = vadd.f32 %v788_v21, %v400_v2 }
  0x9d   :  { %582 = vmatpush.msra.mxu1 %v757_v16 }
  0x9e   :  { %v391_v60 = vpop.f32.mrf.mxu0 }
  0x9f   :  { %583 = vmatpush.msra.mxu1 %v766_v19  ;;  %v392_v61 = vadd.f32 %v788_v21, %v391_v60 }
  0xa2   :  { %v403_v11 = vpop.f32.mrf.mxu3 }
  0xa3   :  { %v404_v25 = vadd.f32 %v788_v21, %v403_v11 }
  0xa6   :  { %v394_v13 = vpop.f32.mrf.mxu0 }
  0xa7   :  { %v395_v14 = vadd.f32 %v788_v21, %v394_v13 }
  0xaa   :  { %v406_v12 = vpop.f32.mrf.mxu3 }
  0xab   :  { %v407_v33 = vadd.f32 %v788_v21, %v406_v12 }
  0xae   :  { %v397_v17 = vpop.f32.mrf.mxu0 }
  0xaf   :  { %v398_v18 = vadd.f32 %v788_v21, %v397_v17 }
 0x115   :  { %v435_v45 = vpop.f32.mrf.mxu1 }
 0x116   :  { %v438_v46 = vadd.f32 %v435_v45, %v389_v44 }
 0x118   :  { %678 = vtanh.f32 %v438_v46 }
 0x11e   :  { %v679_v47 = vpop.eup %678 }
 0x11f   :  { %661 = vmatmul.msk.f32.vlgmr.msra.gmra.mxu2 %vm414_vm7, %v679_v47 }
 0x120   :  { %613 = vmatpush.msra.mxu2 %v593_v29 }
 0x122   :  { %614 = vmatpush.msra.mxu2 %v592_v30 }
 0x124   :  { %615 = vmatpush.msra.mxu2 %v591_v31 }
 0x126   :  { %616 = vmatpush.msra.mxu2 %v590_v32 }
 0x1a2   :  { %v460_v62 = vpop.f32.mrf.mxu2 }
 0x1a3   :  { %v463_v63 = vadd.f32 %v460_v62, %v392_v61 }
 0x1a5   :  { %680 = vtanh.f32 %v463_v63 }
 0x1ab   :  { %v681_v0 = vpop.eup %680 }
 0x1ac   :  { %662 = vmatmul.msk.f32.vlgmr.msrb.gmra.mxu3 %vm414_vm7, %v681_v0 }
 0x22f   :  { %v485_v15 = vpop.f32.mrf.mxu3 }
 0x230   :  { %v488_v3 = vadd.f32 %v485_v15, %v395_v14 }
 0x232   :  { %682 = vtanh.f32 %v488_v3 }
 0x238   :  { %v683_v16 = vpop.eup %682 }
 0x239   :  { %663 = vmatmul.msk.f32.vlgmr.msrb.gmra.mxu1 %vm414_vm7, %v683_v16 }
 0x2b6   :  { %v510_v19 = vpop.f32.mrf.mxu1 }
 0x2b7   :  { %v513_v4 = vadd.f32 %v510_v19, %v398_v18 }
 0x2b9   :  { %684 = vtanh.f32 %v513_v4 }
 0x2bf   :  { %v685_v9 = vpop.eup %684 }
 0x2c0   :  { %664 = vmatmul.msk.f32.vlgmr.msrb.gmra.mxu2 %vm414_vm7, %v685_v9 }
 0x343   :  { %v535_v22 = vpop.f32.mrf.mxu2 }
 0x344   :  { %v538_v23 = vadd.f32 %v535_v22, %v401_v20 }
 0x346   :  { %686 = vtanh.f32 %v538_v23 }
 0x34c   :  { %v687_v24 = vpop.eup %686 }
 0x34d   :  { %665 = vmatmul.msk.f32.vlgmr.msra.gmra.mxu3 %vm414_vm7, %v687_v24 }
 0x3d0   :  { %v560_v26 = vpop.f32.mrf.mxu3 }
 0x3d1   :  { %v563_v27 = vadd.f32 %v560_v26, %v404_v25 }
 0x3d3   :  { %688 = vtanh.f32 %v563_v27 }
 0x3d9   :  { %v689_v28 = vpop.eup %688 }
 0x3da   :  { %666 = vmatmul.msk.f32.vlgmr.msra.gmra.mxu1 %vm414_vm7, %v689_v28 }
 0x457   :  { %v585_v34 = vpop.f32.mrf.mxu1 }
 0x458   :  { %v588_v35 = vadd.f32 %v585_v34, %v407_v33 }
 0x45a   :  { %690 = vtanh.f32 %v588_v35 }
 0x460   :  { %v691_v36 = vpop.eup %690 }
 0x461   :  { %667 = vmatmul.msk.f32.vlgmr.msra.gmra.mxu2 %vm414_vm7, %v691_v36  ;;  %vm630_vm7 = vcmask 1024  }
 0x4e4   :  { %v618_v38 = vpop.f32.mrf.mxu2 }
 0x4e5   :  { %v619_v39 = vadd.f32 %v673_v37, %v618_v38 }
 0x4e7   :  { %v621_v41 = vmax.f32 %v619_v39, 0.0 }
 0x4e9   :  { %v623_v42 = vmul.f32 %v674_v40, %v621_v41 }
 0x4eb   :  { %v625_v21 = vsel %vm624_vm2, %v623_v42, 0.0 }
 0x4ec   :  { %626 = vadd.xlane.f32.xlu0 %v625_v21 }
 0x55f   :  { %v627_v44 = vpop.xlane.xlu0 %626 }
 0x560   :  { %v629_v45 = vadd.f32 %v675_v43, %v627_v44 }
 0x562   :  { %631 = vst.msk [vmem:[%s864_s2] sm:$0x3] %vm630_vm7, %v629_v45 }
 0x563   :  { %636 = vsyncpa [#allocation3], 1 }

</bundles_post_ra>
